<compile_context>
chip_gen: v7x
topology: tpu7x:2x2x1
jax: 0.10.0
libtpu: 0.0.40
codegen_flags: <defaults>
</compile_context>

<pallas_src>
import functools

import jax
import jax.numpy as jnp
import numpy as np
from jax.experimental import pallas as pl
from jax.experimental.pallas import tpu as pltpu


def bcnn_loss_kernel(o_ref, t_ref, w_ref, cw_ref, out_ref, acc_ref, *, hw_total):
    hb = pl.program_id(1)
    nhb = pl.num_programs(1)
    tile = acc_ref.shape[1]

    @pl.when(hb == 0)
    def _init():
        acc_ref[...] = jnp.zeros_like(acc_ref)

    # Validity mask for the (possibly ragged / padded) last HW tile.
    lane = jax.lax.broadcasted_iota(jnp.int32, (1, tile), 1)
    valid = lane < (hw_total - hb * tile)                       # (1, tile) bool

    # Per-tile loads; cast to f32 in-kernel (free / hidden under DMA).
    w = w_ref[...].astype(jnp.float32)                          # (1, tile)
    w2 = w * w

    # Regression channels 0..3 (granule 0, offset 0).
    d03 = o_ref[0:4, :].astype(jnp.float32) - t_ref[0:4, :].astype(jnp.float32)
    reg = jnp.where(valid, w2 * d03 * d03, 0.0)                 # (4, tile)

    # Height channel 11 (single row inside granule 1).
    d11 = o_ref[11:12, :].astype(jnp.float32) - t_ref[11:12, :].astype(jnp.float32)
    hgt = jnp.where(valid, w2 * d11 * d11, 0.0)                 # (1, tile)

    # Class channels 4..9 split at the 8-row sublane-granule boundary.
    cls_a = cw_ref[0:4, :].astype(jnp.float32) * (
        t_ref[4:8, :].astype(jnp.float32)
        * jnp.log(o_ref[4:8, :].astype(jnp.float32) + 1e-07))   # (4, tile)
    cls_b = cw_ref[4:6, :].astype(jnp.float32) * (
        t_ref[8:10, :].astype(jnp.float32)
        * jnp.log(o_ref[8:10, :].astype(jnp.float32) + 1e-07))  # (2, tile)
    cls = jnp.where(
        valid,
        jnp.sum(cls_a, axis=0, keepdims=True)
        + jnp.sum(cls_b, axis=0, keepdims=True),
        0.0)                                                    # (1, tile)

    # Merged resident accumulator (rows 0..3: ch0..3, row 4: height, row 5: class).
    acc_ref[0:4, :] += reg
    acc_ref[4:5, :] += hgt
    acc_ref[5:6, :] += cls

    @pl.when(hb == nhb - 1)
    def _finalize():
        row_sums = jnp.sum(acc_ref[...], axis=1, keepdims=True)       # (6, 1)
        out_lane = jax.lax.broadcasted_iota(jnp.int32, (6, 128), 1)
        out_ref[...] = jnp.where(out_lane == 0, row_sums, 0.0)        # (6, 128)


def bcnn_loss(output, target, weight, class_weight):
    """Pallas implementation of BcnnLoss.forward.

    output, target : (N, C, H, W) with C >= 12 (only channels 0..11 are read)
    weight         : (N, H, W)
    class_weight   : (N, 6, H, W)
    Returns tuple of 5 scalar losses
    (category, confidence, class, instance, height).
    """
    N, C, H, W = output.shape
    HW = H * W

    # No channel slice, no spatial pad: just flatten the spatial dims
    # (pure metadata reshape, no extra HBM pass).
    o = output.reshape(N, C, HW)
    t = target.reshape(N, C, HW)
    w = weight.reshape(N, 1, HW)
    cw = class_weight.reshape(N, 6, HW)

    # Generation-aware lane tiling. Per-step (f32) footprint with sublane
    # padding: (16 + 16 + 8 + 8) rows * tile * 4 B, double-buffered, plus the
    # 8-row-padded accumulator -> ~26 MiB at tile=64K, ~13 MiB at tile=32K.
    LANE = 128
    try:
        vmem_bytes = pltpu.get_tpu_info().vmem_capacity_bytes
    except Exception:
        vmem_bytes = 64 << 20  # conservative fallback
    if vmem_bytes >= (100 << 20):       # v5e / v6e: 128 MiB physical VMEM
        max_tile = 65536
        vmem_limit = 48 << 20
    else:                               # v7x: 64 MiB physical VMEM per TC
        max_tile = 32768
        vmem_limit = 32 << 20

    if HW <= max_tile:
        tile_hw = ((HW + LANE - 1) // LANE) * LANE   # one (lane-aligned) block
    else:
        tile_hw = max_tile
    grid = (N, pl.cdiv(HW, tile_hw))

    partials = pl.pallas_call(
        functools.partial(bcnn_loss_kernel, hw_total=HW),
        out_shape=jax.ShapeDtypeStruct((N, 6, 128), jnp.float32),
        grid_spec=pltpu.PrefetchScalarGridSpec(
            num_scalar_prefetch=0,
            grid=grid,
            in_specs=[
                pl.BlockSpec((pl.Squeezed(), C, tile_hw),
                             lambda b, hb: (b, 0, hb)),
                pl.BlockSpec((pl.Squeezed(), C, tile_hw),
                             lambda b, hb: (b, 0, hb)),
                pl.BlockSpec((pl.Squeezed(), 1, tile_hw),
                             lambda b, hb: (b, 0, hb)),
                pl.BlockSpec((pl.Squeezed(), 6, tile_hw),
                             lambda b, hb: (b, 0, hb)),
            ],
            # Per-batch partial block -> batch axis can be a true parallel
            # axis (dual-TC on v7x) with no races on accumulator or output.
            out_specs=pl.BlockSpec((pl.Squeezed(), 6, 128),
                                   lambda b, hb: (b, 0, 0)),
            scratch_shapes=[pltpu.VMEM((6, tile_hw), jnp.float32)],
        ),
        compiler_params=pltpu.CompilerParams(
            dimension_semantics=("parallel", "arbitrary"),
            vmem_limit_bytes=vmem_limit,
        ),
    )(o, t, w, cw)

    per = partials[:, :, 0].sum(axis=0)     # (6,) tiny reduction in the wrapper
    category_loss = per[0]
    confidence_loss = per[3]
    class_loss = -per[5]
    instance_loss = per[1] + per[2]
    height_loss = per[4]
    return (category_loss, confidence_loss, class_loss, instance_loss, height_loss)


def bcnn_loss_ref(output, target, weight, class_weight):
    """Pure-JAX reference (mirrors the PyTorch forward exactly)."""
    category_diff = output[:, 0, ...] - target[:, 0, ...]
    category_loss = jnp.sum((weight * category_diff) ** 2)
    confidence_diff = output[:, 3, ...] - target[:, 3, ...]
    confidence_loss = jnp.sum((weight * confidence_diff) ** 2)
    class_loss = -jnp.sum(
        class_weight * (target[:, 4:10, ...] * jnp.log(output[:, 4:10, ...] + 1e-07)))
    instance_x_diff = output[:, 1, ...] - target[:, 1, ...]
    instance_y_diff = output[:, 2, ...] - target[:, 2, ...]
    instance_loss = jnp.sum((weight * instance_x_diff) ** 2
                            + (weight * instance_y_diff) ** 2)
    height_diff = output[:, 11, ...] - target[:, 11, ...]
    height_loss = jnp.sum((weight * height_diff) ** 2)
    return (category_loss, confidence_loss, class_loss, instance_loss, height_loss)


if __name__ == "__main__":
    # Small shapes consistent with the forward: 12 channels (0..11 used).
    N, C, H, W = 2, 12, 16, 16
    key = jax.random.PRNGKey(0)
    k1, k2, k3, k4 = jax.random.split(key, 4)

    # Keep 'output' strictly positive so log(output + 1e-7) is finite.
    output = jax.random.uniform(k1, (N, C, H, W), jnp.float32, 0.05, 1.0)
    target = jax.random.uniform(k2, (N, C, H, W), jnp.float32, 0.0, 1.0)
    weight = jax.random.uniform(k3, (N, H, W), jnp.float32, 0.0, 2.0)
    class_weight = jax.random.uniform(k4, (N, 6, H, W), jnp.float32, 0.0, 2.0)

    got = bcnn_loss(output, target, weight, class_weight)
    got = jax.block_until_ready(got)

    want = bcnn_loss_ref(output, target, weight, class_weight)
    for g, w_ in zip(got, want):
        np.testing.assert_allclose(np.asarray(g), np.asarray(w_),
                                   rtol=1e-5, atol=1e-5)

    print("KERNEL_OK")
</pallas_src>

<mosaic_0001>
module attributes {stable_mosaic.version = 11 : i64} {
  func.func @bcnn_loss_kernel(%arg0: i32, %arg1: i32, %arg2: memref<1x12x256xf32, #tpu.memory_space<vmem>>, %arg3: memref<1x12x256xf32, #tpu.memory_space<vmem>>, %arg4: memref<1x1x256xf32, #tpu.memory_space<vmem>>, %arg5: memref<1x6x256xf32, #tpu.memory_space<vmem>>, %arg6: memref<1x6x128xf32, #tpu.memory_space<vmem>>, %arg7: memref<6x256xf32, #tpu.memory_space<vmem>>) attributes {dimension_semantics = [#tpu.dimension_semantics<parallel>, #tpu.dimension_semantics<arbitrary>], iteration_bounds = array<i64: 2, 1>, scalar_prefetch = 0 : i64, scratch_operands = 1 : i64, tpu.core_type = #tpu.core_type<tc>, window_params = [{transform_indices = @transform_0, window_bounds = array<i64: 1, 12, 256>}, {transform_indices = @transform_1, window_bounds = array<i64: 1, 12, 256>}, {transform_indices = @transform_2, window_bounds = array<i64: 1, 1, 256>}, {transform_indices = @transform_3, window_bounds = array<i64: 1, 6, 256>}, {transform_indices = @transform_4, window_bounds = array<i64: 1, 6, 128>}]} {
    %c0_i32 = arith.constant 0 : i32
    %0 = arith.cmpi eq, %arg1, %c0_i32 : i32
    %1 = arith.extui %0 : i1 to i32
    %c0_i32_0 = arith.constant 0 : i32
    %2 = arith.cmpi ne, %1, %c0_i32_0 : i32
    scf.if %2 {
      %cst_50 = arith.constant 0.000000e+00 : f32
      %73 = vector.broadcast %cst_50 : f32 to vector<6x256xf32>
      %c0_51 = arith.constant 0 : index
      %c0_52 = arith.constant 0 : index
      %74 = vector.load %arg7[%c0_51, %c0_52] : memref<6x256xf32, #tpu.memory_space<vmem>>, vector<6x256xf32>
      tpu.vector_store %arg7[%c0_51, %c0_52], %73 {strides = array<i32>} : memref<6x256xf32, #tpu.memory_space<vmem>>, vector<6x256xf32>,
    } else {
    }
    %3 = tpu.iota {dimensions = array<i32: 1>} : vector<1x256xi32>
    %c256_i32 = arith.constant 256 : i32
    %4 = arith.muli %arg1, %c256_i32 : i32
    %c256_i32_1 = arith.constant 256 : i32
    %5 = arith.subi %c256_i32_1, %4 : i32
    %6 = vector.broadcast %5 : i32 to vector<1x256xi32>
    %7 = arith.cmpi slt, %3, %6 : vector<1x256xi32>
    %c0 = arith.constant 0 : index
    %c0_2 = arith.constant 0 : index
    %c0_3 = arith.constant 0 : index
    %8 = vector.load %arg4[%c0, %c0_2, %c0_3] : memref<1x1x256xf32, #tpu.memory_space<vmem>>, vector<1x1x256xf32>
    %9 = vector.shape_cast %8 : vector<1x1x256xf32> to vector<1x256xf32>
    %10 = arith.mulf %9, %9 : vector<1x256xf32>
    %c0_4 = arith.constant 0 : index
    %c0_5 = arith.constant 0 : index
    %c0_6 = arith.constant 0 : index
    %11 = vector.load %arg2[%c0_4, %c0_5, %c0_6] : memref<1x12x256xf32, #tpu.memory_space<vmem>>, vector<1x4x256xf32>
    %12 = vector.shape_cast %11 : vector<1x4x256xf32> to vector<4x256xf32>
    %c0_7 = arith.constant 0 : index
    %c0_8 = arith.constant 0 : index
    %c0_9 = arith.constant 0 : index
    %13 = vector.load %arg3[%c0_7, %c0_8, %c0_9] : memref<1x12x256xf32, #tpu.memory_space<vmem>>, vector<1x4x256xf32>
    %14 = vector.shape_cast %13 : vector<1x4x256xf32> to vector<4x256xf32>
    %15 = arith.subf %12, %14 : vector<4x256xf32>
    %16 = vector.broadcast %10 : vector<1x256xf32> to vector<4x256xf32>
    %17 = arith.mulf %16, %15 : vector<4x256xf32>
    %18 = arith.mulf %17, %15 : vector<4x256xf32>
    %cst = arith.constant 0.000000e+00 : f32
    %19 = vector.shape_cast %7 : vector<1x256xi1> to vector<1x256xi1>
    %20 = vector.broadcast %19 : vector<1x256xi1> to vector<4x256xi1>
    %21 = vector.broadcast %cst : f32 to vector<4x256xf32>
    %22 = arith.select %20, %18, %21 : vector<4x256xi1>, vector<4x256xf32>
    %c0_10 = arith.constant 0 : index
    %c11 = arith.constant 11 : index
    %c0_11 = arith.constant 0 : index
    %23 = vector.load %arg2[%c0_10, %c11, %c0_11] : memref<1x12x256xf32, #tpu.memory_space<vmem>>, vector<1x1x256xf32>
    %24 = vector.shape_cast %23 : vector<1x1x256xf32> to vector<1x256xf32>
    %c0_12 = arith.constant 0 : index
    %c11_13 = arith.constant 11 : index
    %c0_14 = arith.constant 0 : index
    %25 = vector.load %arg3[%c0_12, %c11_13, %c0_14] : memref<1x12x256xf32, #tpu.memory_space<vmem>>, vector<1x1x256xf32>
    %26 = vector.shape_cast %25 : vector<1x1x256xf32> to vector<1x256xf32>
    %27 = arith.subf %24, %26 : vector<1x256xf32>
    %28 = arith.mulf %10, %27 : vector<1x256xf32>
    %29 = arith.mulf %28, %27 : vector<1x256xf32>
    %cst_15 = arith.constant 0.000000e+00 : f32
    %30 = vector.broadcast %cst_15 : f32 to vector<1x256xf32>
    %31 = arith.select %7, %29, %30 : vector<1x256xi1>, vector<1x256xf32>
    %c0_16 = arith.constant 0 : index
    %c0_17 = arith.constant 0 : index
    %c0_18 = arith.constant 0 : index
    %32 = vector.load %arg5[%c0_16, %c0_17, %c0_18] : memref<1x6x256xf32, #tpu.memory_space<vmem>>, vector<1x4x256xf32>
    %33 = vector.shape_cast %32 : vector<1x4x256xf32> to vector<4x256xf32>
    %c0_19 = arith.constant 0 : index
    %c4 = arith.constant 4 : index
    %c0_20 = arith.constant 0 : index
    %34 = vector.load %arg3[%c0_19, %c4, %c0_20] : memref<1x12x256xf32, #tpu.memory_space<vmem>>, vector<1x4x256xf32>
    %35 = vector.shape_cast %34 : vector<1x4x256xf32> to vector<4x256xf32>
    %c0_21 = arith.constant 0 : index
    %c4_22 = arith.constant 4 : index
    %c0_23 = arith.constant 0 : index
    %36 = vector.load %arg2[%c0_21, %c4_22, %c0_23] : memref<1x12x256xf32, #tpu.memory_space<vmem>>, vector<1x4x256xf32>
    %37 = vector.shape_cast %36 : vector<1x4x256xf32> to vector<4x256xf32>
    %cst_24 = arith.constant 1.000000e-07 : f32
    %38 = vector.broadcast %cst_24 : f32 to vector<4x256xf32>
    %39 = arith.addf %37, %38 : vector<4x256xf32>
    %40 = math.log %39 : vector<4x256xf32>
    %41 = arith.mulf %35, %40 : vector<4x256xf32>
    %42 = arith.mulf %33, %41 : vector<4x256xf32>
    %c0_25 = arith.constant 0 : index
    %c4_26 = arith.constant 4 : index
    %c0_27 = arith.constant 0 : index
    %43 = vector.load %arg5[%c0_25, %c4_26, %c0_27] : memref<1x6x256xf32, #tpu.memory_space<vmem>>, vector<1x2x256xf32>
    %44 = vector.shape_cast %43 : vector<1x2x256xf32> to vector<2x256xf32>
    %c0_28 = arith.constant 0 : index
    %c8 = arith.constant 8 : index
    %c0_29 = arith.constant 0 : index
    %45 = vector.load %arg3[%c0_28, %c8, %c0_29] : memref<1x12x256xf32, #tpu.memory_space<vmem>>, vector<1x2x256xf32>
    %46 = vector.shape_cast %45 : vector<1x2x256xf32> to vector<2x256xf32>
    %c0_30 = arith.constant 0 : index
    %c8_31 = arith.constant 8 : index
    %c0_32 = arith.constant 0 : index
    %47 = vector.load %arg2[%c0_30, %c8_31, %c0_32] : memref<1x12x256xf32, #tpu.memory_space<vmem>>, vector<1x2x256xf32>
    %48 = vector.shape_cast %47 : vector<1x2x256xf32> to vector<2x256xf32>
    %cst_33 = arith.constant 1.000000e-07 : f32
    %49 = vector.broadcast %cst_33 : f32 to vector<2x256xf32>
    %50 = arith.addf %48, %49 : vector<2x256xf32>
    %51 = math.log %50 : vector<2x256xf32>
    %52 = arith.mulf %46, %51 : vector<2x256xf32>
    %53 = arith.mulf %44, %52 : vector<2x256xf32>
    %cst_34 = arith.constant dense<0.000000e+00> : vector<256xf32>
    %54 = vector.multi_reduction <add>, %42, %cst_34 [0] : vector<4x256xf32> to vector<256xf32>
    %55 = vector.shape_cast %54 : vector<256xf32> to vector<1x256xf32>
    %cst_35 = arith.constant dense<0.000000e+00> : vector<256xf32>
    %56 = vector.multi_reduction <add>, %53, %cst_35 [0] : vector<2x256xf32> to vector<256xf32>
    %57 = vector.shape_cast %56 : vector<256xf32> to vector<1x256xf32>
    %58 = arith.addf %55, %57 : vector<1x256xf32>
    %cst_36 = arith.constant 0.000000e+00 : f32
    %59 = vector.broadcast %cst_36 : f32 to vector<1x256xf32>
    %60 = arith.select %7, %58, %59 : vector<1x256xi1>, vector<1x256xf32>
    %c0_37 = arith.constant 0 : index
    %c0_38 = arith.constant 0 : index
    %61 = vector.load %arg7[%c0_37, %c0_38] : memref<6x256xf32, #tpu.memory_space<vmem>>, vector<4x256xf32>
    %62 = arith.addf %61, %22 : vector<4x256xf32>
    %c0_39 = arith.constant 0 : index
    %c0_40 = arith.constant 0 : index
    %63 = vector.load %arg7[%c0_39, %c0_40] : memref<6x256xf32, #tpu.memory_space<vmem>>, vector<4x256xf32>
    tpu.vector_store %arg7[%c0_39, %c0_40], %62 {strides = array<i32>} : memref<6x256xf32, #tpu.memory_space<vmem>>, vector<4x256xf32>,
    %c4_41 = arith.constant 4 : index
    %c0_42 = arith.constant 0 : index
    %64 = vector.load %arg7[%c4_41, %c0_42] : memref<6x256xf32, #tpu.memory_space<vmem>>, vector<1x256xf32>
    %65 = arith.addf %64, %31 : vector<1x256xf32>
    %c4_43 = arith.constant 4 : index
    %c0_44 = arith.constant 0 : index
    %66 = vector.load %arg7[%c4_43, %c0_44] : memref<6x256xf32, #tpu.memory_space<vmem>>, vector<1x256xf32>
    tpu.vector_store %arg7[%c4_43, %c0_44], %65 {strides = array<i32>} : memref<6x256xf32, #tpu.memory_space<vmem>>, vector<1x256xf32>,
    %c5 = arith.constant 5 : index
    %c0_45 = arith.constant 0 : index
    %67 = vector.load %arg7[%c5, %c0_45] : memref<6x256xf32, #tpu.memory_space<vmem>>, vector<1x256xf32>
    %68 = arith.addf %67, %60 : vector<1x256xf32>
    %c5_46 = arith.constant 5 : index
    %c0_47 = arith.constant 0 : index
    %69 = vector.load %arg7[%c5_46, %c0_47] : memref<6x256xf32, #tpu.memory_space<vmem>>, vector<1x256xf32>
    tpu.vector_store %arg7[%c5_46, %c0_47], %68 {strides = array<i32>} : memref<6x256xf32, #tpu.memory_space<vmem>>, vector<1x256xf32>,
    %c0_i32_48 = arith.constant 0 : i32
    %70 = arith.cmpi eq, %arg1, %c0_i32_48 : i32
    %71 = arith.extui %70 : i1 to i32
    %c0_i32_49 = arith.constant 0 : i32
    %72 = arith.cmpi ne, %71, %c0_i32_49 : i32
    scf.if %72 {
      %c0_50 = arith.constant 0 : index
      %c0_51 = arith.constant 0 : index
      %73 = vector.load %arg7[%c0_50, %c0_51] : memref<6x256xf32, #tpu.memory_space<vmem>>, vector<6x256xf32>
      %cst_52 = arith.constant dense<0.000000e+00> : vector<6xf32>
      %74 = vector.multi_reduction <add>, %73, %cst_52 [1] : vector<6x256xf32> to vector<6xf32>
      %75 = vector.shape_cast %74 : vector<6xf32> to vector<6x1xf32>
      %76 = tpu.iota {dimensions = array<i32: 1>} : vector<6x128xi32>
      %c0_i32_53 = arith.constant 0 : i32
      %77 = vector.broadcast %c0_i32_53 : i32 to vector<6x128xi32>
      %78 = arith.cmpi eq, %76, %77 : vector<6x128xi32>
      %cst_54 = arith.constant 0.000000e+00 : f32
      %79 = vector.shape_cast %75 : vector<6x1xf32> to vector<6x1xf32>
      %80 = vector.broadcast %79 : vector<6x1xf32> to vector<6x128xf32>
      %81 = vector.broadcast %cst_54 : f32 to vector<6x128xf32>
      %82 = arith.select %78, %80, %81 : vector<6x128xi1>, vector<6x128xf32>
      %c0_55 = arith.constant 0 : index
      %c0_56 = arith.constant 0 : index
      %c0_57 = arith.constant 0 : index
      %83 = vector.load %arg6[%c0_55, %c0_56, %c0_57] : memref<1x6x128xf32, #tpu.memory_space<vmem>>, vector<1x6x128xf32>
      %84 = vector.shape_cast %83 : vector<1x6x128xf32> to vector<6x128xf32>
      %85 = vector.shape_cast %82 : vector<6x128xf32> to vector<1x6x128xf32>
      tpu.vector_store %arg6[%c0_55, %c0_56, %c0_57], %85 {strides = array<i32>} : memref<1x6x128xf32, #tpu.memory_space<vmem>>, vector<1x6x128xf32>,
    } else {
    }
    return
  }
  func.func @transform_0(%arg0: i32, %arg1: i32) -> (i32, i32, i32) {
    %c0_i32 = arith.constant 0 : i32
    %c0_i32_0 = arith.constant 0 : i32
    return %arg0, %c0_i32, %arg1 : i32, i32, i32
  }
  func.func @transform_1(%arg0: i32, %arg1: i32) -> (i32, i32, i32) {
    %c0_i32 = arith.constant 0 : i32
    %c0_i32_0 = arith.constant 0 : i32
    return %arg0, %c0_i32, %arg1 : i32, i32, i32
  }
  func.func @transform_2(%arg0: i32, %arg1: i32) -> (i32, i32, i32) {
    %c0_i32 = arith.constant 0 : i32
    %c0_i32_0 = arith.constant 0 : i32
    return %arg0, %c0_i32, %arg1 : i32, i32, i32
  }
  func.func @transform_3(%arg0: i32, %arg1: i32) -> (i32, i32, i32) {
    %c0_i32 = arith.constant 0 : i32
    %c0_i32_0 = arith.constant 0 : i32
    return %arg0, %c0_i32, %arg1 : i32, i32, i32
  }
  func.func @transform_4(%arg0: i32, %arg1: i32) -> (i32, i32, i32) {
    %c0_i32 = arith.constant 0 : i32
    %c0_i32_0 = arith.constant 0 : i32
    %c0_i32_1 = arith.constant 0 : i32
    return %arg0, %c0_i32, %c0_i32_0 : i32, i32, i32
  }
}

</mosaic_0001>

<bundles_post_ra>
// kernel: tpu_custom_call.1
= control target key start
LH: loop header
LB: loop body
LE: loop exit
PB: predicated region body
PF: predicated region fallthrough
CT: control target
= control target key end

     0   :  { %s769_s15 = smov 0   ;;  %s771_s16 = smov 0   ;;  %s852_s0 = inlined_call_operand.vmem [shape: f32[2,12,256], index: 0, kind: input, shape index: {}]   ;;  %s853_s1 = inlined_call_operand.vmem [shape: f32[2,12,256], index: 1, kind: input, shape index: {}]   ;;  %s854_s2 = inlined_call_operand.vmem [shape: f32[2,1,256], index: 2, kind: input, shape index: {}]   ;;  %s855_s3 = inlined_call_operand.vmem [shape: f32[2,6,256], index: 3, kind: input, shape index: {}]   ;;  %s856_s4 = inlined_call_operand.vmem [shape: f32[2,6,128], index: 4, kind: output, shape index: {}]  }
   0x1   :  { %s773_s17 = smov 0  }
   0x2 LB: > { %s26_s18 = sadd.s32 1, %s736_s16  ;;  %p668_p0 = scmp.ge.s32.totalorder %s740_s17, 1  ;;  %s740_s17 = sphi %s773_s17, %s14_s17   ;;  %s736_s16 = sphi %s771_s16, %s860_s16   ;;  %s732_s15 = sphi %s769_s15, %s859_s15  }
   0x3   : > { %p28_p1 = scmp.ge.s32.totalorder %s26_s18, 2  ;;  %p231_p2 = scmp.lt.s32.totalorder %s740_s17, 3 }
   0x5   : > { %s862_s18 = smov (%p28_p1, %s26_s18), 0  ;;  %p232_p3 = pnand %p668_p0, %p231_p2 }
   0x6   : > { %p287_p4 = scmp.lt.s32.totalorder (!%p232_p3), %s732_s15, 1  ;;  %v335_v0 = vlaneseq (!%p232_p3)  ;;  %v742_v1 = vmov (!%p232_p3), 0.0   ;;  %v743_v8 = vmov (!%p232_p3), 1966171168   ;;  %vm436_vm1 = vcmask (!%p232_p3), 1043456  }
   0x7   : > { %235 = sbr.rel (%p232_p3) target bundleno = 224 (0xe0), region = 36  ;;  %333 = vst [vmem:[#allocation2] sm:$0x3f] (!%p232_p3), %v742_v1  ;;  %334 = vst [vmem:[#allocation2 + $0x8] sm:$0x3f] (!%p232_p3), %v742_v1  ;;  %v488_v9 = vunpack.c.l.s4 (!%p232_p3), %v743_v8  ;;  %vm457_vm2 = vcmask (!%p232_p3), 1041408  }
   0x8   : > { %v353_v2 = vshrl.u32 (!%p232_p3), %v335_v0, 7  ;;  %vm820_vm0 = vcmp.lt.s32.totalorder (!%p232_p3), %v335_v0, 256  ;;  %vm537_vm3 = vcmask (!%p232_p3), 1045504  }
   0x9   : > { %v489_v22 = vunpack.c.0.s8 (!%p232_p3), %v488_v9 }
   0xa   : > { %v354_v7 = vsub.s32 (!%p232_p3), 0, %v353_v2  ;;  %v358_v13 = vsub.s32 (!%p232_p3), 1, %v353_v2 }
   0xb   : > { %v815_v37 = vsub.s32 (!%p232_p3), %v489_v22, %v353_v2 }
   0xe   : > { %s864_s15 = smov (!%p287_p4, %s732_s15), 1  ;;  %v476_v33 = vld [vmem:[#allocation2] sm:$0xf]  ;;  %v477_v34 = vld [vmem:[#allocation2 + $0x8] sm:$0xf] }
   0xf   : > { %s681_s19 = sshll.u32 %s864_s15, 5  ;;  %s673_s20 = sshll.u32 %s864_s15, 1  ;;  %v483_v44 = vld [vmem:[#allocation2 + $0x4] ss:$8 sm:$0x3] }
  0x10   : > { %s795_s23 = scalar_lea.vmem %s852_s0, %s681_s19  ;;  %s800_s26 = scalar_lea.vmem %s853_s1, %s681_s19 }
  0x11   : > { %s313_s29 = scalar_lea.vmem %s854_s2, %s673_s20  ;;  %v345_v3 = vld [vmem:[%s795_s23] sm:$0xf]  ;;  %v346_v4 = vld [vmem:[%s795_s23 + $0x8] sm:$0xf]  ;;  %v396_v20 = vld [vmem:[%s795_s23] sm:$0xf0] }
  0x12   : > { %v343_v5 = vld [vmem:[%s313_s29] sm:$0x3]  ;;  %v348_v11 = vld [vmem:[%s800_s26 + $0x8] sm:$0xf]  ;;  %v397_v21 = vld [vmem:[%s795_s23 + $0x8] sm:$0xf0] }
  0x13   : > { %v347_v6 = vld [vmem:[%s800_s26] sm:$0xf]  ;;  %v344_v10 = vmul.f32 %v343_v5, %v343_v5  ;;  %v677_v14 = vld [vmem:[%s795_s23 + $0x13] ss:$8 sm:$0x3]  ;;  %v350_v15 = vsub.f32 %v346_v4, %v348_v11  ;;  %s683_s30 = sshll.u32 %s864_s15, 4 }
  0x14   : > { %v349_v12 = vsub.f32 %v345_v3, %v347_v6  ;;  %v678_v16 = vld [vmem:[%s800_s26 + $0x13] ss:$8 sm:$0x3]  ;;  %v398_v26 = vadd.f32 1e-07, %v396_v20  ;;  %s323_s7 = scalar_lea.vmem %s855_s3, %s683_s30  ;;  %s676_s8 = sshll.u32 %s864_s15, 3 }
  0x15   : > { %v355_v17 = vrot.slane %v344_v10, %v354_v7  ;;  %v359_v18 = vrot.slane %v344_v10, %v358_v13  ;;  %v376_v19 = vsub.f32 %v677_v14, %v678_v16  ;;  %v399_v27 = vadd.f32 1e-07, %v397_v21  ;;  %v418_v28 = vld [vmem:[%s795_s23 + $0x10] sm:$0x3]  ;;  %v419_v32 = vld [vmem:[%s795_s23 + $0x18] sm:$0x3]  ;;  %s328_s11 = scalar_lea.vmem %s856_s4, %s676_s8 }
  0x16   : > { %710 = vlog2.f32 %v398_v26  ;;  %v420_v35 = vadd.f32 1e-07, %v418_v28  ;;  %v421_v36 = vadd.f32 1e-07, %v419_v32  ;;  %v394_v48 = vld [vmem:[%s800_s26] sm:$0xf0] }
  0x17   : > { %v362_v23 = vmul.f32 %v355_v17, %v349_v12  ;;  %v363_v24 = vmul.f32 %v359_v18, %v350_v15  ;;  %v377_v25 = vmul.f32 %v376_v19, %v344_v10  ;;  %712 = vlog2.f32 %v399_v27  ;;  %v395_v51 = vld [vmem:[%s800_s26 + $0x8] sm:$0xf0]  ;;  %v416_v56 = vld [vmem:[%s800_s26 + $0x10] sm:$0x3]  ;;  %v392_v58 = vld [vmem:[%s323_s7] sm:$0xf] }
  0x18   : > { %714 = vlog2.f32 %v420_v35  ;;  %v417_v60 = vld [vmem:[%s800_s26 + $0x18] sm:$0x3]  ;;  %v393_v62 = vld [vmem:[%s323_s7 + $0x8] sm:$0xf]  ;;  %v414_v5 = vld [vmem:[%s323_s7] sm:$0x30] }
  0x19   : > { %v364_v29 = vmul.f32 %v362_v23, %v349_v12  ;;  %v365_v30 = vmul.f32 %v363_v24, %v350_v15  ;;  %v378_v31 = vmul.f32 %v377_v25, %v376_v19  ;;  %716 = vlog2.f32 %v421_v36  ;;  %v415_v8 = vld [vmem:[%s323_s7 + $0x8] sm:$0x30] }
  0x1b   : > { %v383_v38 = vrot.slane %v378_v31, %v354_v7  ;;  %v387_v39 = vrot.slane %v378_v31, %v358_v13  ;;  %v478_v40 = vadd.f32 %v476_v33, %v364_v29  ;;  %v479_v41 = vadd.f32 %v477_v34, %v365_v30 }
  0x1d   : > { %480 = vst [vmem:[#allocation2] sm:$0xf] %v478_v40  ;;  %481 = vst [vmem:[#allocation2 + $0x8] sm:$0xf] %v479_v41  ;;  %v486_v42 = vcombine.low %v383_v38, %v387_v39 }
  0x1f   : > { %v493_v43 = vrot.slane %v486_v42, %v815_v37 }
  0x20   : > { %v711_v47 = vpop.eup %710 }
  0x21   : > { %v500_v45 = vrot.slane %v493_v43, %v815_v37  ;;  %v713_v50 = vpop.eup %712  ;;  %v401_v52 = vmul.f32 0.6931472, %v711_v47 }
  0x22   : > { %v403_v53 = vmul.f32 0.6931472, %v713_v50  ;;  %v715_v54 = vpop.eup %714 }
  0x23   : > { %v502_v49 = vadd.f32 %v500_v45, %v483_v44  ;;  %v404_v55 = vmul.f32 %v401_v52, %v394_v48  ;;  %v717_v57 = vpop.eup %716  ;;  %v423_v61 = vmul.f32 0.6931472, %v715_v54 }
  0x24   : > { %v405_v59 = vmul.f32 %v403_v53, %v395_v51  ;;  %v425_v1 = vmul.f32 0.6931472, %v717_v57  ;;  %v336_v57 = vand.u32 127, %v335_v0 }
  0x25   : > { %507 = vst.msk [vmem:[#allocation2 + $0x4] ss:$8 sm:$0x3] %vm820_vm0, %v502_v49  ;;  %v408_v63 = vrot.slane %v404_v55, 4  ;;  %v426_v3 = vmul.f32 %v423_v61, %v416_v56 }
  0x26   : > { %v409_v2 = vrot.slane %v405_v59, 4  ;;  %v427_v6 = vmul.f32 %v425_v1, %v417_v60  ;;  %v510_v49 = vld [vmem:[#allocation2 + $0x5] ss:$8 sm:$0x3]  ;;  %vm543_vm4 = vcmp.eq.s32.totalorder %v336_v57, 0 }
  0x27   : > { %v412_v4 = vmul.f32 %v408_v63, %v392_v58  ;;  %v430_v9 = vrot.slane %v426_v3, 4 }
  0x28   : > { %v413_v7 = vmul.f32 %v409_v2, %v393_v62  ;;  %v431_v10 = vrot.slane %v427_v6, 4 }
  0x29   : > { %v437_v11 = vsel %vm436_vm1, %v412_v4, 0.0  ;;  %v434_v12 = vmul.f32 %v430_v9, %v414_v5 }
  0x2a   : > { %v438_v13 = vrot.slane %v437_v11, 4  ;;  %v444_v14 = vsel %vm436_vm1, %v413_v7, 0.0  ;;  %v435_v15 = vmul.f32 %v431_v10, %v415_v8 }
  0x2b   : > { %v445_v16 = vrot.slane %v444_v14, 4  ;;  %v453_v18 = vrot.slane %v434_v12, 4 }
  0x2c   : > { %v439_v17 = vadd.f32 %v438_v13, %v437_v11  ;;  %v454_v20 = vrot.slane %v435_v15, 4 }
  0x2d   : > { %v446_v19 = vadd.f32 %v445_v16, %v444_v14  ;;  %v458_v22 = vsel %vm457_vm2, %v453_v18, 0.0 }
  0x2e   : > { %v440_v21 = vrot.slane %v439_v17, 2  ;;  %v459_v24 = vrot.slane %v458_v22, 4  ;;  %v465_v25 = vsel %vm457_vm2, %v454_v20, 0.0 }
  0x2f   : > { %v447_v23 = vrot.slane %v446_v19, 2  ;;  %v466_v27 = vrot.slane %v465_v25, 4 }
  0x30   : > { %v441_v26 = vadd.f32 %v440_v21, %v439_v17  ;;  %v460_v29 = vadd.f32 %v459_v24, %v458_v22 }
  0x31   : > { %v448_v28 = vadd.f32 %v447_v23, %v446_v19  ;;  %v467_v30 = vadd.f32 %v466_v27, %v465_v25 }
  0x32   : > { %v442_v31 = vrot.slane %v441_v26, 1  ;;  %v461_v32 = vrot.slane %v460_v29, 2 }
  0x33   : > { %v449_v33 = vrot.slane %v448_v28, 1  ;;  %v468_v34 = vrot.slane %v467_v30, 2 }
  0x34   : > { %v462_v35 = vadd.f32 %v461_v32, %v460_v29  ;;  %v443_v38 = vadd.f32 %v442_v31, %v441_v26 }
  0x35   : > { %v469_v36 = vadd.f32 %v468_v34, %v467_v30  ;;  %v450_v40 = vadd.f32 %v449_v33, %v448_v28 }
  0x36   : > { %v463_v39 = vrot.slane %v462_v35, 1 }
  0x37   : > { %v470_v41 = vrot.slane %v469_v36, 1 }
  0x38   : > { %v464_v42 = vadd.f32 %v463_v39, %v462_v35 }
  0x39   : > { %v471_v43 = vadd.f32 %v470_v41, %v469_v36 }
  0x3a   : > { %v472_v44 = vadd.f32 %v464_v42, %v443_v38 }
  0x3b   : > { %v473_v45 = vadd.f32 %v471_v43, %v450_v40 }
  0x3d   : > { %v513_v47 = vcombine.low %v472_v44, %v473_v45 }
  0x3f   : > { %v520_v48 = vrot.slane %v513_v47, %v815_v37 }
  0x41   : > { %v527_v50 = vrot.slane %v520_v48, %v815_v37 }
  0x43   : > { %v529_v51 = vadd.f32 %v527_v50, %v510_v49 }
  0x45   : > { %530 = vst.msk [vmem:[#allocation2 + $0x5] ss:$8 sm:$0x3] %vm820_vm0, %v529_v51 }
  0x4c   : > { %v535_v52 = vld [vmem:[#allocation2] sm:$0x3f]  ;;  %v536_v53 = vld [vmem:[#allocation2 + $0x8] sm:$0x3f] }
  0x4d   : > { %v538_v54 = vsel %vm537_vm3, %v535_v52, 0.0  ;;  %v539_v55 = vsel %vm537_vm3, %v536_v53, 0.0 }
  0x4e   : > { %v540_v56 = vadd.f32 %v539_v55, %v538_v54 }
  0x50   : > { %541 = vadd.xlane.f32.xlu0 %v540_v56 }
  0xdd   : > { %v542_v37 = vpop.xlane.xlu0 %541 }
  0xde   : > { %v544_v58 = vsel %vm543_vm4, %v542_v37, 0.0 }
  0xdf   : > { %545 = vst [vmem:[%s328_s11] sm:$0x3f] %v544_v58 }
  0xe0 PF: > { %s14_s17 = sadd.s32 1, %s740_s17   ;;  %s859_s15 = smov %s736_s16 }
  0xe1   : > { %p11_p5 = scmp.ge.s32.totalorder %s14_s17, 4   ;;  %s860_s16 = smov %s862_s18 }
  0xe3   :  { %13 = sbr.rel (!%p11_p5) target bundleno = 2 (0x2), region = 87 }

</bundles_post_ra>
